<compile_context>
chip_gen: v7x
topology: tpu7x:2x2x1
jax: 0.10.0
libtpu: 0.0.40
codegen_flags: <defaults>
</compile_context>

<pallas_src>
import functools

import jax
import jax.numpy as jnp
from jax.experimental import pallas as pl
from jax.experimental.pallas import tpu as pltpu


def gcn_kernel(adj_ref, x_ref, w_ref, b_ref, o_ref):
    """One grid step processes a block of `bt` batches.

    adj_ref: (N, N)          bf16, grid-invariant
    x_ref:   (bt, N, Din)    bf16
    w_ref:   (Din, Dout_p)   bf16, pre-transposed + lane-padded, grid-invariant
    b_ref:   (1, Dout_p)     f32,  grid-invariant
    o_ref:   (bt, N, Dout_p) f32
    """
    bt, N, Din = x_ref.shape
    Dout_p = o_ref.shape[-1]

    # 1) Linear first (weights are batch-independent): fold the batch block
    #    into the MXU M dimension -> one (bt*N, Din) @ (Din, Dout_p) matmul.
    x2d = x_ref[...].reshape(bt * N, Din)
    z = jnp.dot(x2d, w_ref[...], preferred_element_type=jnp.float32)
    z = z.reshape(bt, N, Dout_p).astype(jnp.bfloat16)

    adj = adj_ref[...]
    bias = b_ref[...]

    # 2) Graph aggregation + bias + ReLU per batch in the block (static
    #    unroll, bt is small).  adj @ z[b] is an (N,N)@(N,Dout_p) MXU matmul
    #    with f32 accumulation.
    for b in range(bt):
        y = jnp.dot(adj, z[b], preferred_element_type=jnp.float32) + bias
        o_ref[b] = jnp.maximum(y, 0.0).astype(o_ref.dtype)


def _pick_batch_block(B, N):
    """Batch-block size: aim for bt*N >= ~256 MXU rows per step, must divide
    B, and leave >= 2 grid steps when B >= 2 (v7x has 2 TensorCores)."""
    target = max(1, (256 + N - 1) // N)
    bt = min(B, target)
    while bt > 1 and (B % bt != 0 or B // bt < 2):
        bt -= 1
    return max(bt, 1)


@jax.jit
def gcn_layer_forward(x, adj, w, b):
    """x: (B, N, Din) f32, adj: (N, N) f32, w: (Dout, Din) f32, b: (Dout,) f32
    returns (B, N, Dout) f32"""
    B, N, Din = x.shape
    Dout = w.shape[0]

    # Lane-pad the filter axis to a multiple of 128 -> lane-dense output
    # block, unmasked stores.  MXU is 128/256 wide anyway, so the extra
    # columns are free compute; they are zero and sliced off below.
    Dout_p = ((Dout + 127) // 128) * 128

    wt = jnp.transpose(w)                           # (Din, Dout), no in-kernel .T
    bias = b
    if Dout_p != Dout:
        wt = jnp.pad(wt, ((0, 0), (0, Dout_p - Dout)))
        bias = jnp.pad(bias, (0, Dout_p - Dout))
    b2d = bias.reshape(1, Dout_p).astype(jnp.float32)

    # bf16 MXU operands; accumulation stays f32 inside the kernel.
    adj_c = adj.astype(jnp.bfloat16)
    x_c = x.astype(jnp.bfloat16)
    wt_c = wt.astype(jnp.bfloat16)

    bt = _pick_batch_block(B, N)
    grid = (B // bt,)

    grid_spec = pltpu.PrefetchScalarGridSpec(
        num_scalar_prefetch=0,
        grid=grid,
        in_specs=[
            pl.BlockSpec((N, N), lambda i: (0, 0)),           # adj   (shared)
            pl.BlockSpec((bt, N, Din), lambda i: (i, 0, 0)),  # x batch block
            pl.BlockSpec((Din, Dout_p), lambda i: (0, 0)),    # W^T   (shared)
            pl.BlockSpec((1, Dout_p), lambda i: (0, 0)),      # bias  (shared)
        ],
        out_specs=pl.BlockSpec((bt, N, Dout_p), lambda i: (i, 0, 0)),
    )

    out_p = pl.pallas_call(
        gcn_kernel,
        out_shape=jax.ShapeDtypeStruct((B, N, Dout_p), jnp.float32),
        grid_spec=grid_spec,
        compiler_params=pltpu.CompilerParams(
            dimension_semantics=("parallel",),
        ),
    )(adj_c, x_c, wt_c, b2d)

    if Dout_p != Dout:
        out_p = out_p[..., :Dout]
    return out_p


if __name__ == "__main__":
    # Small shapes consistent with the module: batch=2, N=16 nodes,
    # num_of_features (T*D) = 32, num_of_filter = 8.
    B, N, Din, Dout = 2, 16, 32, 8

    key = jax.random.PRNGKey(0)
    k_x, k_adj, k_w, k_b = jax.random.split(key, 4)

    x = jax.random.normal(k_x, (B, N, Din), dtype=jnp.float32)
    adj = jax.random.uniform(k_adj, (N, N), dtype=jnp.float32)

    # Deterministic parameter init mimicking nn.Linear (uniform +/- 1/sqrt(Din)).
    bound = 1.0 / (Din ** 0.5)
    w = jax.random.uniform(k_w, (Dout, Din), minval=-bound, maxval=bound,
                           dtype=jnp.float32)
    b = jax.random.uniform(k_b, (Dout,), minval=-bound, maxval=bound,
                           dtype=jnp.float32)

    out = jax.block_until_ready(gcn_layer_forward(x, adj, w, b))

    # Pure-JAX f32 reference in the original (adj @ x) @ W^T order.
    ref = jnp.maximum(jnp.einsum("nm,bmd->bnd", adj, x) @ w.T + b, 0.0)
    assert out.shape == (B, N, Dout), out.shape
    # bf16 MXU operands with f32 accumulation + reassociation: bf16-level tol.
    assert jnp.allclose(out, ref, atol=5e-2, rtol=5e-2), float(
        jnp.max(jnp.abs(out - ref)))

    print("KERNEL_OK")
</pallas_src>

<mosaic_0001>
module attributes {stable_mosaic.version = 11 : i64} {
  func.func @gcn_kernel(%arg0: i32, %arg1: memref<16x16xbf16, #tpu.memory_space<vmem>>, %arg2: memref<1x16x32xbf16, #tpu.memory_space<vmem>>, %arg3: memref<32x128xbf16, #tpu.memory_space<vmem>>, %arg4: memref<1x128xf32, #tpu.memory_space<vmem>>, %arg5: memref<1x16x128xf32, #tpu.memory_space<vmem>>) attributes {dimension_semantics = [#tpu.dimension_semantics<parallel>], iteration_bounds = array<i64: 2>, scalar_prefetch = 0 : i64, scratch_operands = 0 : i64, tpu.core_type = #tpu.core_type<tc>, window_params = [{pipeline_mode = #tpu.pipeline_mode<synchronous>, transform_indices = @transform_0, window_bounds = array<i64: 16, 16>}, {transform_indices = @transform_1, window_bounds = array<i64: 1, 16, 32>}, {pipeline_mode = #tpu.pipeline_mode<synchronous>, transform_indices = @transform_2, window_bounds = array<i64: 32, 128>}, {pipeline_mode = #tpu.pipeline_mode<synchronous>, transform_indices = @transform_3, window_bounds = array<i64: 1, 128>}, {transform_indices = @transform_4, window_bounds = array<i64: 1, 16, 128>}]} {
    %c0 = arith.constant 0 : index
    %c0_0 = arith.constant 0 : index
    %c0_1 = arith.constant 0 : index
    %0 = vector.load %arg2[%c0, %c0_0, %c0_1] : memref<1x16x32xbf16, #tpu.memory_space<vmem>>, vector<1x16x32xbf16>
    %1 = vector.shape_cast %0 : vector<1x16x32xbf16> to vector<16x32xbf16>
    %c0_2 = arith.constant 0 : index
    %c0_3 = arith.constant 0 : index
    %2 = vector.load %arg3[%c0_2, %c0_3] : memref<32x128xbf16, #tpu.memory_space<vmem>>, vector<32x128xbf16>
    %cst = arith.constant dense<0.000000e+00> : vector<16x128xf32>
    %3 = tpu.matmul %1, %2, %cst {dimension_numbers = #tpu.dot_dimension_numbers<[1], [0], [0], [1], [0, 0, 1, 1], [], []>} : vector<16x32xbf16>, vector<32x128xbf16>, vector<16x128xf32> -> vector<16x128xf32>
    %4 = vector.shape_cast %3 : vector<16x128xf32> to vector<1x16x128xf32>
    %5 = arith.truncf %4 : vector<1x16x128xf32> to vector<1x16x128xbf16>
    %c0_4 = arith.constant 0 : index
    %c0_5 = arith.constant 0 : index
    %6 = vector.load %arg1[%c0_4, %c0_5] : memref<16x16xbf16, #tpu.memory_space<vmem>>, vector<16x16xbf16>
    %c0_6 = arith.constant 0 : index
    %c0_7 = arith.constant 0 : index
    %7 = vector.load %arg4[%c0_6, %c0_7] : memref<1x128xf32, #tpu.memory_space<vmem>>, vector<1x128xf32>
    %8 = vector.shape_cast %5 : vector<1x16x128xbf16> to vector<16x128xbf16>
    %cst_8 = arith.constant dense<0.000000e+00> : vector<16x128xf32>
    %9 = tpu.matmul %6, %8, %cst_8 {dimension_numbers = #tpu.dot_dimension_numbers<[1], [0], [0], [1], [0, 0, 1, 1], [], []>} : vector<16x16xbf16>, vector<16x128xbf16>, vector<16x128xf32> -> vector<16x128xf32>
    %10 = vector.broadcast %7 : vector<1x128xf32> to vector<16x128xf32>
    %11 = arith.addf %9, %10 : vector<16x128xf32>
    %cst_9 = arith.constant 0.000000e+00 : f32
    %12 = vector.broadcast %cst_9 : f32 to vector<16x128xf32>
    %13 = arith.maximumf %11, %12 : vector<16x128xf32>
    %c0_10 = arith.constant 0 : index
    %c0_11 = arith.constant 0 : index
    %c0_12 = arith.constant 0 : index
    %14 = vector.load %arg5[%c0_10, %c0_11, %c0_12] : memref<1x16x128xf32, #tpu.memory_space<vmem>>, vector<1x16x128xf32>
    %15 = vector.shape_cast %14 : vector<1x16x128xf32> to vector<16x128xf32>
    %16 = vector.shape_cast %13 : vector<16x128xf32> to vector<1x16x128xf32>
    tpu.vector_store %arg5[%c0_10, %c0_11, %c0_12], %16 {strides = array<i32>} : memref<1x16x128xf32, #tpu.memory_space<vmem>>, vector<1x16x128xf32>,
    return
  }
  func.func @transform_0(%arg0: i32) -> (i32, i32) {
    %c0_i32 = arith.constant 0 : i32
    %c0_i32_0 = arith.constant 0 : i32
    %c0_i32_1 = arith.constant 0 : i32
    return %c0_i32, %c0_i32_0 : i32, i32
  }
  func.func @transform_1(%arg0: i32) -> (i32, i32, i32) {
    %c0_i32 = arith.constant 0 : i32
    %c0_i32_0 = arith.constant 0 : i32
    %c0_i32_1 = arith.constant 0 : i32
    return %arg0, %c0_i32, %c0_i32_0 : i32, i32, i32
  }
  func.func @transform_2(%arg0: i32) -> (i32, i32) {
    %c0_i32 = arith.constant 0 : i32
    %c0_i32_0 = arith.constant 0 : i32
    %c0_i32_1 = arith.constant 0 : i32
    return %c0_i32, %c0_i32_0 : i32, i32
  }
  func.func @transform_3(%arg0: i32) -> (i32, i32) {
    %c0_i32 = arith.constant 0 : i32
    %c0_i32_0 = arith.constant 0 : i32
    %c0_i32_1 = arith.constant 0 : i32
    return %c0_i32, %c0_i32_0 : i32, i32
  }
  func.func @transform_4(%arg0: i32) -> (i32, i32, i32) {
    %c0_i32 = arith.constant 0 : i32
    %c0_i32_0 = arith.constant 0 : i32
    %c0_i32_1 = arith.constant 0 : i32
    return %arg0, %c0_i32, %c0_i32_0 : i32, i32, i32
  }
}

</mosaic_0001>

<bundles_post_ra>
// kernel: gcn_layer_forward.1
= control target key start
LH: loop header
LB: loop body
LE: loop exit
PB: predicated region body
PF: predicated region fallthrough
CT: control target
= control target key end

     0   :  { %s474_s15 = smov 0   ;;  %s503_s0 = inlined_call_operand.vmem [shape: bf16[16,16], index: 0, kind: input, shape index: {}]   ;;  %s504_s1 = inlined_call_operand.vmem [shape: bf16[2,16,32], index: 1, kind: input, shape index: {}]   ;;  %s505_s2 = inlined_call_operand.vmem [shape: bf16[32,128], index: 2, kind: input, shape index: {}]   ;;  %s506_s3 = inlined_call_operand.vmem [shape: f32[1,128], index: 3, kind: input, shape index: {}]   ;;  %s507_s4 = inlined_call_operand.vmem [shape: f32[2,16,128], index: 4, kind: output, shape index: {}]  }
   0x1 LB: > { %s386_s16 = sadd.s32 4294967295, %s445_s15   ;;  %p390_p0 = scmp.ge.s32.totalorder %s445_s15, 1  ;;  %s445_s15 = sphi %s474_s15, %s14_s15  }
   0x2   : > { %p162_p1 = scmp.lt.s32.totalorder %s445_s15, 3 }
   0x4   : > { %p163_p2 = pnand %p390_p0, %p162_p1 }
   0x5   : > { %v435_v0 = vld [vmem:[%s505_s2] sm:$0xff] (!%p163_p2)   ;;  %v447_v1 = vmov (!%p163_p2), 0.0   ;;  %v436_v2 = vld [vmem:[%s505_s2 + $0x8] sm:$0xff] (!%p163_p2)   ;;  %vm448_vm0 = vmmov (!%p163_p2), 0   ;;  %p188_p3 = scmp.lt.s32.totalorder (!%p163_p2), %s386_s16, 1  ;;  %vm222_vm1 = vcmask (!%p163_p2), 261120  }
   0x6   : > { %166 = sbr.rel (%p163_p2) target bundleno = 455 (0x1c7), region = 36  ;;  %411 = vmatprep.subr.bf16.mxu0 (!%p163_p2), %v447_v1  ;;  %419 = vmatprep.subr.bf16.mxu1 (!%p163_p2), %v447_v1  ;;  %v438_v9 = vld [vmem:[%s503_s0] sm:$0xff] (!%p163_p2)   ;;  %vm282_vm2 = vcmask (!%p163_p2), 130048  }
   0x7   : > { %412 = vmatpush3.bf16.msra.mxu0 (!%p163_p2), %v435_v0  ;;  %415 = vmatprep.mubr.msk.bf16.mxu0 (!%p163_p2), %vm448_vm0, %v447_v1  ;;  %v399_v10 = vld [vmem:[%s506_s3] ss:$0 sm:$0xff] (!%p163_p2) }
   0x8   : > { %413 = vmatprep.subr.bf16.mxu0 (!%p163_p2), %v447_v1  ;;  %421 = vmatprep.mubr.msk.bf16.mxu1 (!%p163_p2), %vm448_vm0, %v447_v1 }
   0xb   : > { %414 = vmatpush3.bf16.msra.mxu0 (!%p163_p2), %v436_v2 }
   0xd   : > { %s509_s16 = smov (!%p188_p3, %s386_s16), 1 }
   0xe   : > { %s404_s21 = sshll.u32 %s509_s16, 3  ;;  %s405_s29 = sshll.u32 %s509_s16, 4 }
   0xf   : > { %s192_s24 = scalar_lea.vmem %s504_s1, %s404_s21  ;;  %s197_s6 = scalar_lea.vmem %s507_s4, %s405_s29 }
  0x10   : > { %v437_v3 = vld [vmem:[%s192_s24] sm:$0xff]  }
  0x11   : > { %416 = vmatmul.mubr.msk.bf16.vlgmr.msra.gmra.mrb[0].mxu0 %vm222_vm1, %v437_v3 }
  0xe4   : > { %v260_v4 = vpop.f32.mrb[0].mxu0 }
  0xe5   : > { %v417_v5 = vpop.f32.mrb[1].mxu0 }
  0xe6   : > { %v263_v6 = vpop.f32.mrb[2].mxu0 }
  0xe7   : > { %v267_v7 = vpack.c.bf16 %v263_v6, %v260_v4  ;;  %v418_v8 = vpop.f32.mrb[3].mxu0 }
  0xe9   : > { %420 = vmatpush3.bf16.msra.mxu1 %v267_v7 }
  0xec   : > { %422 = vmatmul.mubr.msk.bf16.vlgmr.msra.gmra.mrb[0].mxu1 %vm282_vm2, %v438_v9 }
 0x1bf   : > { %v320_v11 = vpop.f32.mrb[0].mxu1 }
 0x1c0   : > { %v321_v12 = vadd.f32 %v399_v10, %v320_v11  ;;  %v423_v13 = vpop.f32.mrb[1].mxu1 }
 0x1c1   : > { %v323_v14 = vpop.f32.mrb[2].mxu1 }
 0x1c2   : > { %v327_v15 = vmax.f32 %v321_v12, 0.0  ;;  %v324_v16 = vadd.f32 %v399_v10, %v323_v14  ;;  %v424_v17 = vpop.f32.mrb[3].mxu1 }
 0x1c4   : > { %329 = vst [vmem:[%s197_s6] sm:$0xff] %v327_v15  ;;  %v328_v18 = vmax.f32 %v324_v16, 0.0 }
 0x1c6   : > { %330 = vst [vmem:[%s197_s6 + $0x8] sm:$0xff] %v328_v18 }
 0x1c7 PF: > { %s14_s15 = sadd.s32 1, %s445_s15  }
 0x1c8   : > { %p11_p4 = scmp.ge.s32.totalorder %s14_s15, 4  }
 0x1ca   :  { %13 = sbr.rel (!%p11_p4) target bundleno = 1 (0x1), region = 66 }

</bundles_post_ra>
